<compile_context>
chip_gen: v7x
topology: tpu7x:2x2x1
jax: 0.10.0
libtpu: 0.0.40
codegen_flags: <defaults>
</compile_context>

<pallas_src>
import functools
import numpy as np
import jax
import jax.numpy as jnp
from jax.experimental import pallas as pl
from jax.experimental.pallas import tpu as pltpu

# ----------------------------- configuration ----------------------------------------------------
N_STREAMS = 2
C1_IN = 3
# c2 per stage; last stage >=128 so C2PSA's num_heads = c//64 >= 1 (as in the PyTorch code)
C2 = [16, 32, 32, 64, 64, 64, 64, 128, 128, 128, 128]
C1_LIST = [C1_IN] + C2[:-1]


def _round_up(v, m):
    return ((v + m - 1) // m) * m


# ----------------------------- the one fused matmul kernel ---------------------------------------
def _mm_kernel(*refs, ksizes, act, has_res):
    """acc = sum_i x_i @ w[k_off_i : k_off_i + K_i]  + b ; optional SiLU ; optional +residual.
    f32 accumulate / f32 epilogue (v5e-safe), bf16 store."""
    nc = len(ksizes)
    x_refs = refs[:nc]
    w_ref = refs[nc]
    b_ref = refs[nc + 1]
    res_ref = refs[nc + 2] if has_res else None
    o_ref = refs[-1]

    acc = None
    off = 0
    for i, kk in enumerate(ksizes):
        d = jnp.dot(x_refs[i][0], w_ref[0, off:off + kk, :],
                    preferred_element_type=jnp.float32)
        acc = d if acc is None else acc + d
        off += kk
    acc = acc + b_ref[0]
    if act:
        acc = acc * jax.nn.sigmoid(acc)          # SiLU (f32 math, EUP sigmoid)
    if has_res:
        acc = acc + res_ref[0].astype(jnp.float32)
    o_ref[0] = acc.astype(o_ref.dtype)           # bf16 store


def matmul_fused(chunks, w, b, *, act, residual=None):
    """chunks: list of (G, M, K_i) activations;  w: (G, sum K_i, N) bf16;  b: (G, 1, N) f32;
    residual: optional (G, M, N).  Returns (G, M, N) bf16."""
    G, M, _ = chunks[0].shape
    Ktot = int(w.shape[-2])
    N = int(w.shape[-1])
    ksizes = tuple(int(c.shape[-1]) for c in chunks)
    assert sum(ksizes) == Ktot

    if M <= 128:
        TM = M
    elif M <= 1024:
        TM = 128
    else:
        TM = 256
    Mp = _round_up(M, TM)

    def prep(t):
        t = t.astype(jnp.bfloat16)
        if Mp != M:
            t = jnp.pad(t, ((0, 0), (0, Mp - M), (0, 0)))
        return t

    has_res = residual is not None
    args = [prep(c) for c in chunks] + [w.astype(jnp.bfloat16), b.astype(jnp.float32)]
    in_specs = ([pl.BlockSpec((1, TM, kk), lambda g, m: (g, m, 0)) for kk in ksizes]
                + [pl.BlockSpec((1, Ktot, N), lambda g, m: (g, 0, 0)),
                   pl.BlockSpec((1, 1, N), lambda g, m: (g, 0, 0))])
    if has_res:
        args.append(prep(residual))
        in_specs.append(pl.BlockSpec((1, TM, N), lambda g, m: (g, m, 0)))

    out = pl.pallas_call(
        functools.partial(_mm_kernel, ksizes=ksizes, act=act, has_res=has_res),
        out_shape=jax.ShapeDtypeStruct((G, Mp, N), jnp.bfloat16),
        grid=(G, Mp // TM),
        in_specs=in_specs,
        out_specs=pl.BlockSpec((1, TM, N), lambda g, m: (g, m, 0)),
        compiler_params=pltpu.CompilerParams(
            dimension_semantics=("parallel", "parallel")),
    )(*args)
    if Mp != M:
        out = out[:, :M]
    return out


# ----------------------------- conv wrappers ------------------------------------------------------
def im2col_3x3(x, stride):
    """NHWC 3x3 / pad-1 im2col: (..., H, W, C) -> (..., Ho, Wo, 9*C).  XLA glue (9 strided slices
    + concat fuse into one small copy feeding the Pallas matmul); gives the MXU the full K=9*C."""
    H, W = x.shape[-3], x.shape[-2]
    Ho = (H - 1) // stride + 1
    Wo = (W - 1) // stride + 1
    pads = [(0, 0)] * (x.ndim - 3) + [(1, 1), (1, 1), (0, 0)]
    xp = jnp.pad(x, pads)
    cols = [xp[..., i:i + stride * (Ho - 1) + 1:stride,
               j:j + stride * (Wo - 1) + 1:stride, :]
            for i in range(3) for j in range(3)]
    return jnp.concatenate(cols, axis=-1), Ho, Wo


def conv_apply(p, x, act=True, residual=None):
    """Conv2d(bias=False)+BN(+SiLU) with BN pre-folded into packed (w, b).  x: (G,B,H,W,Cin)."""
    G, B, H, W, _ = x.shape
    if p["k"] == 3:
        xc, Ho, Wo = im2col_3x3(x, p["s"])
    else:
        xc, Ho, Wo = x, H, W
    res = None if residual is None else residual.reshape(G, B * Ho * Wo, p["cout"])
    out = matmul_fused([xc.reshape(G, B * Ho * Wo, xc.shape[-1])],
                       p["w"], p["b"], act=act, residual=res)
    return out.reshape(G, B, Ho, Wo, p["cout"])


def conv_multi(p, xs, act=True):
    """1x1 conv over a channel-concat of `xs`, with the concat fused into the kernel as K-chunks."""
    G, B, H, W, _ = xs[0].shape
    chunks = [t.reshape(G, B * H * W, t.shape[-1]) for t in xs]
    out = matmul_fused(chunks, p["w"], p["b"], act=act)
    return out.reshape(G, B, H, W, p["cout"])


# ----------------------------- plain-JAX glue (too tiny to deserve a Pallas launch) --------------
def maxpool5(x):
    # TODO(synk): SPPF 5x5/s1/p2 max-pool on a 2x2 map left to lax.reduce_window (XLA fusion).
    return jax.lax.reduce_window(
        x, jnp.array(-jnp.inf, x.dtype), jax.lax.max,
        window_dimensions=(1, 1, 5, 5, 1), window_strides=(1, 1, 1, 1, 1),
        padding=((0, 0), (0, 0), (2, 2), (2, 2), (0, 0)))


def dwconv3x3(x, p):
    # TODO(synk): depthwise (groups=C) 3x3 positional-encoding conv on a 2x2 map kept as plain-JAX
    # shift-and-accumulate; not a matmul hot path.
    G, B, H, W, C = x.shape
    xp = jnp.pad(x.astype(jnp.float32), ((0, 0), (0, 0), (1, 1), (1, 1), (0, 0)))
    out = jnp.zeros((G, B, H, W, C), jnp.float32)
    for i in range(3):
        for j in range(3):
            out = out + xp[:, :, i:i + H, j:j + W, :] * p["w"][:, 0, i, j][None, None, None, None, :]
    return out + p["b"][None, None, None, None, :]


def stream_max(x, n_streams):
    # TODO(synk): per-stream elementwise max on <=64KB tensors left to XLA (a Pallas launch costs more).
    _, SB, H, W, C = x.shape
    return jnp.max(x.reshape(n_streams, SB // n_streams, H, W, C).astype(jnp.float32), axis=0)


# ----------------------------- parameter init (deterministic, BN folded, pre-packed) -------------
class KeyGen:
    def __init__(self, seed):
        self.key = jax.random.PRNGKey(seed)

    def __call__(self):
        self.key, sub = jax.random.split(self.key)
        return sub


def make_conv(kg, cin, cout, k, s=1, streams=1):
    """Packed conv: BN folded, im2col row order, bf16 weights, per-stream stacking done once."""
    ws, bs = [], []
    for _ in range(streams):
        w = jax.random.normal(kg(), (cout, cin, k, k), jnp.float32) / np.sqrt(cin * k * k)
        gamma = 1.0 + 0.1 * jax.random.normal(kg(), (cout,), jnp.float32)
        beta = 0.1 * jax.random.normal(kg(), (cout,), jnp.float32)
        mu = 0.1 * jax.random.normal(kg(), (cout,), jnp.float32)
        var = jnp.abs(1.0 + 0.1 * jax.random.normal(kg(), (cout,), jnp.float32))
        scale = gamma / jnp.sqrt(var + 1e-3)                 # ultralytics BN eps=1e-3
        wf = w * scale[:, None, None, None]
        bf = beta - mu * scale
        ws.append(jnp.transpose(wf, (2, 3, 1, 0)).reshape(k * k * cin, cout))  # im2col row order
        bs.append(bf.reshape(1, cout))
    return {"w": jnp.stack(ws).astype(jnp.bfloat16),         # (S, K, cout)
            "b": jnp.stack(bs).astype(jnp.float32),          # (S, 1, cout)
            "k": k, "s": s, "cout": cout}


def merge_convs_n(p1, p2):
    """Two convs on the same input -> one conv with outputs concatenated along N."""
    return {"w": jnp.concatenate([p1["w"], p2["w"]], axis=-1),
            "b": jnp.concatenate([p1["b"], p2["b"]], axis=-1),
            "k": p1["k"], "s": p1["s"], "cout": p1["cout"] + p2["cout"]}


def make_dwconv(kg, c):
    w = jax.random.normal(kg(), (c, 1, 3, 3), jnp.float32) / 3.0
    gamma = 1.0 + 0.1 * jax.random.normal(kg(), (c,), jnp.float32)
    beta = 0.1 * jax.random.normal(kg(), (c,), jnp.float32)
    mu = 0.1 * jax.random.normal(kg(), (c,), jnp.float32)
    var = jnp.abs(1.0 + 0.1 * jax.random.normal(kg(), (c,), jnp.float32))
    scale = gamma / jnp.sqrt(var + 1e-3)
    return {"w": w * scale[:, None, None, None], "b": beta - mu * scale}


def init_bottleneck(kg, c1, c2, shortcut=True, k=(3, 3), e=0.5, streams=1):
    c_ = int(c2 * e)
    return {"cv1": make_conv(kg, c1, c_, k[0], streams=streams),
            "cv2": make_conv(kg, c_, c2, k[1], streams=streams),
            "add": bool(shortcut and c1 == c2)}


def init_c3k(kg, c1, c2, n=2, shortcut=True, e=0.5, streams=1):
    c_ = int(c2 * e)
    cv1 = make_conv(kg, c1, c_, 1, streams=streams)
    cv2 = make_conv(kg, c1, c_, 1, streams=streams)
    return {"c_": c_,
            "cv12": merge_convs_n(cv1, cv2),                  # fused cv1+cv2 (one matmul)
            "cv3": make_conv(kg, 2 * c_, c2, 1, streams=streams),
            "m": [init_bottleneck(kg, c_, c_, shortcut, (3, 3), 1.0, streams) for _ in range(n)]}


def init_c3k2(kg, c1, c2, n=1, c3k=False, e=0.5, shortcut=True, streams=1):
    c = int(c2 * e)
    return {"c": c, "c3k": c3k,
            "cv1": make_conv(kg, c1, 2 * c, 1, streams=streams),
            "cv2": make_conv(kg, (2 + n) * c, c2, 1, streams=streams),
            "m": [init_c3k(kg, c, c, 2, shortcut, 0.5, streams) if c3k
                  else init_bottleneck(kg, c, c, shortcut, (3, 3), 0.5, streams) for _ in range(n)]}


def init_sppf(kg, c1, c2):
    c_ = c1 // 2
    return {"cv1": make_conv(kg, c1, c_, 1), "cv2": make_conv(kg, c_ * 4, c2, 1)}


def init_attention(kg, dim, num_heads, attn_ratio=0.5):
    head_dim = dim // num_heads
    key_dim = int(head_dim * attn_ratio)
    h = dim + key_dim * num_heads * 2
    return {"nh": num_heads, "kd": key_dim, "hd": head_dim, "scale": key_dim ** -0.5,
            "qkv": make_conv(kg, dim, h, 1),
            "proj": make_conv(kg, dim, dim, 1),
            "pe": make_dwconv(kg, dim)}


def init_psablock(kg, c):
    return {"attn": init_attention(kg, c, max(1, c // 64), 0.5),
            "ffn1": make_conv(kg, c, c * 2, 1),
            "ffn2": make_conv(kg, c * 2, c, 1)}


def init_c2psa(kg, c1, c2, n=1, e=0.5):
    assert c1 == c2
    c = int(c1 * e)
    return {"c": c,
            "cv1": make_conv(kg, c1, 2 * c, 1),
            "cv2": make_conv(kg, 2 * c, c1, 1),
            "m": [init_psablock(kg, c) for _ in range(n)]}


def init_model(seed=42):
    kg = KeyGen(seed)
    S = N_STREAMS
    return {
        "conv_0": make_conv(kg, C1_LIST[0], C2[0], 3, s=2, streams=S),
        "conv_1": make_conv(kg, C1_LIST[1], C2[1], 3, s=2, streams=S),
        "C3k2_2": init_c3k2(kg, C1_LIST[2], C2[2], 1, False, 0.25, streams=S),
        "conv_3": make_conv(kg, C1_LIST[3], C2[3], 3, s=2),
        "C3k2_4": init_c3k2(kg, C1_LIST[4], C2[4], 1, False, 0.25),
        "conv_5": make_conv(kg, C1_LIST[5], C2[5], 3, s=2),
        "C3k2_6": init_c3k2(kg, C1_LIST[6], C2[6], 1, True),
        "conv_7": make_conv(kg, C1_LIST[7], C2[7], 3, s=2),
        "C3k2_8": init_c3k2(kg, C1_LIST[8], C2[8], 1, True),
        "SPPF_9": init_sppf(kg, C1_LIST[9], C2[9]),
        "C2PSA_10": init_c2psa(kg, C1_LIST[10], C2[10]),
    }


# ----------------------------- module forward (G,B,H,W,C layout; mirrors PyTorch) ----------------
def bottleneck_apply(p, x):
    y = conv_apply(p["cv1"], x)
    return conv_apply(p["cv2"], y, residual=x if p["add"] else None)   # residual fused in-kernel


def c3k_apply(p, x):
    y = conv_apply(p["cv12"], x)                   # cv1 & cv2 in one matmul (N-merged weights)
    c_ = p["c_"]
    y1, y2 = y[..., :c_], y[..., c_:]
    for bp in p["m"]:
        y1 = bottleneck_apply(bp, y1)
    return conv_multi(p["cv3"], [y1, y2])          # concat fused as K-chunks


def c3k2_apply(p, x):
    y = conv_apply(p["cv1"], x)
    c = p["c"]
    outs = [y[..., :c], y[..., c:]]
    cur = outs[-1]
    for mp in p["m"]:
        cur = c3k_apply(mp, cur) if p["c3k"] else bottleneck_apply(mp, cur)
        outs.append(cur)
    return conv_multi(p["cv2"], outs)              # concat fused as K-chunks


def sppf_apply(p, x):
    y = [conv_apply(p["cv1"], x)]
    for _ in range(3):
        y.append(maxpool5(y[-1]))
    return conv_multi(p["cv2"], y)                 # concat fused as K-chunks


def attention_apply(p, x, residual=None):
    G, B, H, W, C = x.shape
    nh, kd, hd = p["nh"], p["kd"], p["hd"]
    Np = H * W
    qkv = conv_apply(p["qkv"], x, act=False)                        # (G,B,H,W,h)
    qkv = qkv.reshape(G * B, Np, nh, 2 * kd + hd).transpose(0, 2, 1, 3)
    q, k, v = qkv[..., :kd], qkv[..., kd:2 * kd], qkv[..., 2 * kd:]
    # TODO(synk): attention math at Np=H*W=4 left to XLA (einsum/softmax); a Pallas kernel here
    # would be pure launch overhead.
    qf, kf, vf = (t.astype(jnp.float32) for t in (q, k, v))
    s = jnp.einsum("bhnd,bhmd->bhnm", qf, kf) * p["scale"]
    a = jax.nn.softmax(s, axis=-1)
    o = jnp.einsum("bhnm,bhmd->bhnd", a, vf)
    o = o.transpose(0, 2, 1, 3).reshape(G, B, H, W, C)
    v_sp = vf.transpose(0, 2, 1, 3).reshape(G, B, H, W, C)
    pe = dwconv3x3(v_sp, p["pe"])
    y = (o + pe).astype(jnp.bfloat16)
    return conv_apply(p["proj"], y, act=False, residual=residual)   # PSA residual fused in proj


def psablock_apply(p, x):
    x = attention_apply(p["attn"], x, residual=x)
    h = conv_apply(p["ffn1"], x)
    return conv_apply(p["ffn2"], h, act=False, residual=x)          # FFN residual fused


def c2psa_apply(p, x):
    y = conv_apply(p["cv1"], x)
    c = p["c"]
    a, b = y[..., :c], y[..., c:]
    for bp in p["m"]:
        b = psablock_apply(bp, b)
    return conv_multi(p["cv2"], [a, b])


def forward(params, x):
    # channel repeat to N*c1 channels, then split into per-stream 3-channel images
    if x.shape[1] != N_STREAMS * C1_IN:
        x = jnp.tile(x, (1, N_STREAMS * C1_IN // x.shape[1], 1, 1))
    B = x.shape[0]
    x = x.transpose(0, 2, 3, 1).astype(jnp.bfloat16)                 # NCHW -> NHWC, bf16 once
    xs = jnp.stack([x[..., i * 3:(i + 1) * 3] for i in range(N_STREAMS)], axis=0)  # (S,B,H,W,3)

    # per-stream (unshared) layers: one pallas_call each with a stream grid axis (G = 2)
    x0 = conv_apply(params["conv_0"], xs)
    x1 = conv_apply(params["conv_1"], x0)
    x2 = c3k2_apply(params["C3k2_2"], x1)

    # shared-weight layers: streams folded into the batch dim (G = 1)
    xb = x2.reshape(1, N_STREAMS * B, *x2.shape[2:])
    x3 = conv_apply(params["conv_3"], xb)
    x4 = c3k2_apply(params["C3k2_4"], x3)
    x4_max = stream_max(x4, N_STREAMS)
    x5 = conv_apply(params["conv_5"], x4)
    x6 = c3k2_apply(params["C3k2_6"], x5)
    x6_max = stream_max(x6, N_STREAMS)
    x7 = conv_apply(params["conv_7"], x6)
    x8 = c3k2_apply(params["C3k2_8"], x7)
    x9 = sppf_apply(params["SPPF_9"], x8)
    x10 = c2psa_apply(params["C2PSA_10"], x9)
    x10_max = stream_max(x10, N_STREAMS)

    to_nchw = lambda t: t.astype(jnp.float32).transpose(0, 3, 1, 2)
    return [None, None, None, None, to_nchw(x4_max), None, to_nchw(x6_max),
            None, None, None, to_nchw(x10_max)]


# ----------------------------- parity checks (review correctness concerns) -----------------------
def _check_conv_against_lax():
    """im2col 3x3 path (stride 1 & 2, odd spatial) vs lax.conv_general_dilated + bias + SiLU."""
    kg = KeyGen(7)
    for stride in (1, 2):
        p = make_conv(kg, 5, 24, 3, s=stride, streams=1)
        x = jax.random.normal(jax.random.PRNGKey(stride), (1, 2, 9, 11, 5), jnp.float32)
        xq = x.astype(jnp.bfloat16)
        out = conv_apply(p, xq)                                        # (1,2,Ho,Wo,24) bf16
        w_hwio = p["w"][0].astype(jnp.float32).reshape(3, 3, 5, 24)
        ref = jax.lax.conv_general_dilated(
            xq[0].astype(jnp.float32), w_hwio, window_strides=(stride, stride),
            padding=((1, 1), (1, 1)), dimension_numbers=("NHWC", "HWIO", "NHWC"))
        ref = ref + p["b"][0, 0]
        ref = ref * jax.nn.sigmoid(ref)
        np.testing.assert_allclose(np.asarray(out[0], np.float32), np.asarray(ref),
                                   rtol=2e-2, atol=2e-2)


def _check_multi_chunk():
    """Concat-fused multi-chunk matmul vs plain concatenation feeding the same kernel."""
    kg = KeyGen(11)
    p = make_conv(kg, 24, 32, 1)
    a = jax.random.normal(jax.random.PRNGKey(3), (1, 2, 4, 4, 16), jnp.bfloat16)
    b = jax.random.normal(jax.random.PRNGKey(4), (1, 2, 4, 4, 8), jnp.bfloat16)
    fused = conv_multi(p, [a, b])
    ref = conv_apply(p, jnp.concatenate([a, b], axis=-1))
    np.testing.assert_allclose(np.asarray(fused, np.float32), np.asarray(ref, np.float32),
                               rtol=2e-2, atol=2e-2)


# ----------------------------- main ---------------------------------------------------------------
if __name__ == "__main__":
    _check_conv_against_lax()
    _check_multi_chunk()

    params = init_model(seed=42)
    x = jax.random.normal(jax.random.PRNGKey(0), (2, 3, 64, 64), jnp.float32)   # NCHW input

    fwd = jax.jit(lambda inp: forward(params, inp))
    outs = fwd(x)
    x4_max, x6_max, x10_max = outs[4], outs[6], outs[10]
    jax.block_until_ready((x4_max, x6_max, x10_max))

    assert x4_max.shape == (2, 64, 8, 8), x4_max.shape
    assert x6_max.shape == (2, 64, 4, 4), x6_max.shape
    assert x10_max.shape == (2, 128, 2, 2), x10_max.shape
    assert bool(jnp.all(jnp.isfinite(x4_max)) & jnp.all(jnp.isfinite(x6_max))
                & jnp.all(jnp.isfinite(x10_max)))
    print("KERNEL_OK")
</pallas_src>

<mosaic_0001>
module attributes {stable_mosaic.version = 11 : i64} {
  func.func @_mm_kernel(%arg0: i32, %arg1: i32, %arg2: memref<1x128x45xbf16, #tpu.memory_space<vmem>>, %arg3: memref<1x45x24xbf16, #tpu.memory_space<vmem>>, %arg4: memref<1x1x24xf32, #tpu.memory_space<vmem>>, %arg5: memref<1x128x24xbf16, #tpu.memory_space<vmem>>) attributes {dimension_semantics = [#tpu.dimension_semantics<parallel>, #tpu.dimension_semantics<parallel>], iteration_bounds = array<i64: 1, 2>, scalar_prefetch = 0 : i64, scratch_operands = 0 : i64, tpu.core_type = #tpu.core_type<tc>, window_params = [{transform_indices = @transform_0, window_bounds = array<i64: 1, 128, 45>}, {transform_indices = @transform_1, window_bounds = array<i64: 1, 45, 24>}, {transform_indices = @transform_2, window_bounds = array<i64: 1, 1, 24>}, {transform_indices = @transform_3, window_bounds = array<i64: 1, 128, 24>}]} {
    %c0 = arith.constant 0 : index
    %c0_0 = arith.constant 0 : index
    %c0_1 = arith.constant 0 : index
    %0 = vector.load %arg2[%c0, %c0_0, %c0_1] : memref<1x128x45xbf16, #tpu.memory_space<vmem>>, vector<1x128x45xbf16>
    %1 = vector.shape_cast %0 : vector<1x128x45xbf16> to vector<128x45xbf16>
    %c0_2 = arith.constant 0 : index
    %c0_3 = arith.constant 0 : index
    %c0_4 = arith.constant 0 : index
    %2 = vector.load %arg3[%c0_2, %c0_3, %c0_4] : memref<1x45x24xbf16, #tpu.memory_space<vmem>>, vector<1x45x24xbf16>
    %3 = vector.shape_cast %2 : vector<1x45x24xbf16> to vector<45x24xbf16>
    %cst = arith.constant dense<0.000000e+00> : vector<128x24xf32>
    %4 = tpu.matmul %1, %3, %cst {dimension_numbers = #tpu.dot_dimension_numbers<[1], [0], [0], [1], [0, 0, 1, 1], [], []>} : vector<128x45xbf16>, vector<45x24xbf16>, vector<128x24xf32> -> vector<128x24xf32>
    %c0_5 = arith.constant 0 : index
    %c0_6 = arith.constant 0 : index
    %c0_7 = arith.constant 0 : index
    %5 = vector.load %arg4[%c0_5, %c0_6, %c0_7] : memref<1x1x24xf32, #tpu.memory_space<vmem>>, vector<1x1x24xf32>
    %6 = vector.shape_cast %5 : vector<1x1x24xf32> to vector<1x24xf32>
    %7 = vector.broadcast %6 : vector<1x24xf32> to vector<128x24xf32>
    %8 = arith.addf %4, %7 : vector<128x24xf32>
    %9 = arith.negf %8 : vector<128x24xf32>
    %10 = math.exp %9 : vector<128x24xf32>
    %cst_8 = arith.constant 1.000000e+00 : f32
    %11 = vector.broadcast %cst_8 : f32 to vector<128x24xf32>
    %12 = arith.addf %11, %10 : vector<128x24xf32>
    %13 = arith.divf %11, %12 : vector<128x24xf32>
    %14 = arith.mulf %8, %13 : vector<128x24xf32>
    %15 = arith.truncf %14 : vector<128x24xf32> to vector<128x24xbf16>
    %c0_9 = arith.constant 0 : index
    %c0_10 = arith.constant 0 : index
    %c0_11 = arith.constant 0 : index
    %16 = vector.load %arg5[%c0_9, %c0_10, %c0_11] : memref<1x128x24xbf16, #tpu.memory_space<vmem>>, vector<1x128x24xbf16>
    %17 = vector.shape_cast %16 : vector<1x128x24xbf16> to vector<128x24xbf16>
    %18 = vector.shape_cast %15 : vector<128x24xbf16> to vector<1x128x24xbf16>
    tpu.vector_store %arg5[%c0_9, %c0_10, %c0_11], %18 {strides = array<i32>} : memref<1x128x24xbf16, #tpu.memory_space<vmem>>, vector<1x128x24xbf16>,
    return
  }
  func.func @transform_0(%arg0: i32, %arg1: i32) -> (i32, i32, i32) {
    %c0_i32 = arith.constant 0 : i32
    %c0_i32_0 = arith.constant 0 : i32
    return %arg0, %arg1, %c0_i32 : i32, i32, i32
  }
  func.func @transform_1(%arg0: i32, %arg1: i32) -> (i32, i32, i32) {
    %c0_i32 = arith.constant 0 : i32
    %c0_i32_0 = arith.constant 0 : i32
    %c0_i32_1 = arith.constant 0 : i32
    return %arg0, %c0_i32, %c0_i32_0 : i32, i32, i32
  }
  func.func @transform_2(%arg0: i32, %arg1: i32) -> (i32, i32, i32) {
    %c0_i32 = arith.constant 0 : i32
    %c0_i32_0 = arith.constant 0 : i32
    %c0_i32_1 = arith.constant 0 : i32
    return %arg0, %c0_i32, %c0_i32_0 : i32, i32, i32
  }
  func.func @transform_3(%arg0: i32, %arg1: i32) -> (i32, i32, i32) {
    %c0_i32 = arith.constant 0 : i32
    %c0_i32_0 = arith.constant 0 : i32
    return %arg0, %arg1, %c0_i32 : i32, i32, i32
  }
}

</mosaic_0001>

<bundles_post_ra>
// kernel: tpu_custom_call.1
= control target key start
LH: loop header
LB: loop body
LE: loop exit
PB: predicated region body
PF: predicated region fallthrough
CT: control target
= control target key end

     0   :  { %s1032_s12 = smov 0   ;;  %s1034_s13 = smov 0   ;;  %s1208_s0 = inlined_call_operand.vmem [shape: bf16[1,256,45], index: 0, kind: input, shape index: {}]   ;;  %s1209_s1 = inlined_call_operand.vmem [shape: bf16[1,45,24], index: 1, kind: input, shape index: {}]   ;;  %s1210_s2 = inlined_call_operand.vmem [shape: f32[1,1,24], index: 2, kind: input, shape index: {}]   ;;  %s1211_s3 = inlined_call_operand.vmem [shape: bf16[1,256,24], index: 3, kind: output, shape index: {}]  }
   0x1   :  { %s1036_s14 = smov 0  }
   0x2 LB: > { %s22_s15 = sadd.s32 1, %s1005_s13  ;;  %p773_p0 = scmp.ge.s32.totalorder %s1009_s14, 1  ;;  %s1009_s14 = sphi %s1036_s14, %s13_s14   ;;  %s1005_s13 = sphi %s1034_s13, %s1213_s13   ;;  %s1001_s12 = sphi %s1032_s12, %s1212_s12  }
   0x3   : > { %p23_p1 = scmp.ge.s32.totalorder %s22_s15, 2  ;;  %p176_p2 = scmp.lt.s32.totalorder %s1009_s14, 3 }
   0x5   : > { %s1215_s15 = smov (%p23_p1, %s22_s15), 0  ;;  %p177_p3 = pnand %p773_p0, %p176_p2 }
   0x6   : > { %v912_v0 = vld [vmem:[%s1209_s1] sm:$0xff] (!%p177_p3)   ;;  %vm356_vm0 = vcmask (!%p177_p3), 1045504   ;;  %v913_v1 = vld [vmem:[%s1209_s1 + $0x8] sm:$0xff] (!%p177_p3)   ;;  %vm357_vm1 = vcmask (!%p177_p3), 1046528   ;;  %v914_v2 = vld [vmem:[%s1209_s1 + $0x10] sm:$0x7f] (!%p177_p3)  }
   0x7   : > { %180 = sbr.rel (%p177_p3) target bundleno = 292 (0x124), region = 32  ;;  %859 = vmatprep.subr.bf16.mxu0 (!%p177_p3), %v912_v0  ;;  %881 = vmatprep.subr.bf16.mxu1 (!%p177_p3), %v912_v0  ;;  %s774_s22 = sshll.u32 (!%p177_p3), %s1001_s12, 4  ;;  %v1011_v3 = vmov (!%p177_p3), 65535   ;;  %vm331_vm2 = vcmask (!%p177_p3), 367616   ;;  %v1078_v15 = vld [vmem:[%s1210_s2] ss:$0 sm:$0xff] (!%p177_p3) }
   0x8   : > { %860 = vmatpush3.bf16.msra.mxu0 (!%p177_p3), %v912_v0  ;;  %884 = vmatpush3.bf16.msra.mxu1 (!%p177_p3), %v912_v0  ;;  %v358_v4 = vsel (!%p177_p3), %vm356_vm0, 4294967295, %v1011_v3  ;;  %p219_p4 = scmp.lt.s32.totalorder (!%p177_p3), %s774_s22, 31  ;;  %vm636_vm3 = vcmask (!%p177_p3), 191488  }
   0x9   : > { %861 = vmatprep.subr.bf16.mxu0 (!%p177_p3), %v913_v1  ;;  %882 = vmatprep.subr.bf16.mxu1 (!%p177_p3), %v913_v1  ;;  %v359_v5 = vsel (!%p177_p3), %vm357_vm1, %v358_v4, 0 }
   0xa   : > { %v361_v6 = vand.u32 (!%p177_p3), %v914_v2, %v359_v5 }
   0xc   : > { %862 = vmatpush3.bf16.msra.mxu0 (!%p177_p3), %v913_v1  ;;  %885 = vmatpush3.bf16.msra.mxu1 (!%p177_p3), %v913_v1 }
   0xd   : > { %863 = vmatprep.subr.bf16.mxu0 (!%p177_p3), %v361_v6  ;;  %883 = vmatprep.subr.bf16.mxu1 (!%p177_p3), %v361_v6 }
   0xe   : > { %s1217_s22 = smov (!%p219_p4, %s774_s22), 31 }
   0xf   : > { %s775_s23 = sshll.u32 %s1217_s22, 2 }
  0x10   : > { %s224_s26 = scalar_lea.vmem %s1208_s0, %s775_s23  ;;  %864 = vmatpush3.bf16.msra.mxu0 %v361_v6  ;;  %886 = vmatpush3.bf16.msra.mxu1 %v361_v6  ;;  %s1150_s4 = scalar_lea.vmem %s1211_s3, %s775_s23 }
  0x11   : > { %v915_v7 = vld [vmem:[%s224_s26] sm:$0xff]   ;;  %v917_v9 = vld [vmem:[%s224_s26 + $0x8] sm:$0xff]   ;;  %v919_v11 = vld [vmem:[%s224_s26 + $0x10] sm:$0xff]  }
  0x12   : > { %v916_v8 = vld [vmem:[%s224_s26 + $0x20] sm:$0xff]   ;;  %865 = vmatprep.mubr.msk.bf16.mxu0 %vm331_vm2, %v915_v7  ;;  %v918_v10 = vld [vmem:[%s224_s26 + $0x28] sm:$0xff]   ;;  %v920_v12 = vld [vmem:[%s224_s26 + $0x30] sm:$0xff]  }
  0x13   : > { %873 = vmatprep.mubr.msk.bf16.mxu1 %vm331_vm2, %v916_v8  ;;  %866 = vmatmul.mubr.msk.bf16.vlgmr.msra.gmra.mrb[0].mxu0 %vm331_vm2, %v917_v9  ;;  %v921_v13 = vld [vmem:[%s224_s26 + $0x18] sm:$0xff]  }
  0x14   : > { %874 = vmatmul.mubr.msk.bf16.vlgmr.msra.gmra.mrb[0].mxu1 %vm331_vm2, %v918_v10  ;;  %869 = vmatprep.mubr.msk.bf16.mxu0 %vm331_vm2, %v919_v11  ;;  %v922_v14 = vld [vmem:[%s224_s26 + $0x38] sm:$0xff]  }
  0x15   : > { %877 = vmatprep.mubr.msk.bf16.mxu1 %vm331_vm2, %v920_v12 }
  0x1b   : > { %870 = vmatmul.mubr.msk.bf16.gmra.mrb[4].mxu0 %vm331_vm2, %v921_v13 }
  0x1c   : > { %878 = vmatmul.mubr.msk.bf16.gmra.mrb[4].mxu1 %vm331_vm2, %v922_v14 }
  0xe6   : > { %v867_v16 = vpop.f32.mrb[0].mxu0 }
  0xe7   : > { %v1081_v17 = vadd.f32 %v867_v16, %v1078_v15  ;;  %v875_v18 = vpop.f32.mrb[0].mxu1  ;;  %v397_v19 = vpop.f32.mrb[1].mxu0 }
  0xe8   : > { %v1084_v20 = vadd.f32 %v875_v18, %v1078_v15  ;;  %v1087_v21 = vadd.f32 %v1078_v15, %v397_v19  ;;  %v429_v22 = vpop.f32.mrb[1].mxu1  ;;  %v868_v23 = vpop.f32.mrb[2].mxu0 }
  0xe9   : > { %v800_v24 = vmul.f32 -1.442695, %v1081_v17  ;;  %v1091_v25 = vadd.f32 %v1078_v15, %v429_v22  ;;  %v1094_v26 = vadd.f32 %v868_v23, %v1078_v15  ;;  %v876_v27 = vpop.f32.mrb[2].mxu1  ;;  %v400_v28 = vpop.f32.mrb[3].mxu0 }
  0xea   : > { %v808_v29 = vmul.f32 -1.442695, %v1084_v20  ;;  %v798_v30 = vmul.f32 -1.442695, %v1087_v21  ;;  %v1099_v31 = vadd.f32 %v876_v27, %v1078_v15  ;;  %v1102_v32 = vadd.f32 %v1078_v15, %v400_v28  ;;  %v432_v33 = vpop.f32.mrb[3].mxu1 }
  0xeb   : > { %923 = vpow2.f32 %v800_v24  ;;  %v806_v34 = vmul.f32 -1.442695, %v1091_v25  ;;  %v801_v35 = vmul.f32 -1.442695, %v1094_v26  ;;  %v1107_v36 = vadd.f32 %v1078_v15, %v432_v33 }
  0xec   : > { %925 = vpow2.f32 %v808_v29  ;;  %v809_v37 = vmul.f32 -1.442695, %v1099_v31  ;;  %v799_v38 = vmul.f32 -1.442695, %v1102_v32 }
  0xed   : > { %927 = vpow2.f32 %v798_v30  ;;  %v807_v39 = vmul.f32 -1.442695, %v1107_v36 }
  0xee   : > { %929 = vpow2.f32 %v806_v34  ;;  %v871_v40 = vpop.f32.mrb[4].mxu0 }
  0xef   : > { %931 = vpow2.f32 %v801_v35  ;;  %v1113_v41 = vadd.f32 %v871_v40, %v1078_v15  ;;  %v879_v42 = vpop.f32.mrb[4].mxu1  ;;  %v413_v43 = vpop.f32.mrb[5].mxu0 }
  0xf0   : > { %933 = vpow2.f32 %v809_v37  ;;  %v1116_v44 = vadd.f32 %v879_v42, %v1078_v15  ;;  %v1119_v45 = vadd.f32 %v1078_v15, %v413_v43  ;;  %v445_v46 = vpop.f32.mrb[5].mxu1  ;;  %v872_v47 = vpop.f32.mrb[6].mxu0 }
  0xf1   : > { %935 = vpow2.f32 %v799_v38  ;;  %v804_v48 = vmul.f32 -1.442695, %v1113_v41  ;;  %v1123_v49 = vadd.f32 %v1078_v15, %v445_v46  ;;  %v1126_v50 = vadd.f32 %v872_v47, %v1078_v15  ;;  %v880_v51 = vpop.f32.mrb[6].mxu1  ;;  %v416_v52 = vpop.f32.mrb[7].mxu0 }
  0xf2   : > { %937 = vpow2.f32 %v807_v39  ;;  %v812_v53 = vmul.f32 -1.442695, %v1116_v44  ;;  %v802_v54 = vmul.f32 -1.442695, %v1119_v45  ;;  %v448_v55 = vpop.f32.mrb[7].mxu1  ;;  %v1133_v11 = vadd.f32 %v880_v51, %v1078_v15 }
  0xf3   : > { %939 = vpow2.f32 %v804_v48  ;;  %v810_v56 = vmul.f32 -1.442695, %v1123_v49  ;;  %v805_v57 = vmul.f32 -1.442695, %v1126_v50  ;;  %v1136_v14 = vadd.f32 %v1078_v15, %v416_v52 }
  0xf4   : > { %941 = vpow2.f32 %v812_v53  ;;  %v1139_v19 = vadd.f32 %v1078_v15, %v448_v55  ;;  %v813_v28 = vmul.f32 -1.442695, %v1133_v11 }
  0xf5   : > { %v924_v58 = vpop.eup %923  ;;  %943 = vpow2.f32 %v802_v54  ;;  %v803_v33 = vmul.f32 -1.442695, %v1136_v14 }
  0xf6   : > { %v926_v59 = vpop.eup %925  ;;  %v510_v60 = vadd.f32 1.0, %v924_v58  ;;  %945 = vpow2.f32 %v810_v56  ;;  %v811_v15 = vmul.f32 -1.442695, %v1139_v19 }
  0xf7   : > { %v928_v61 = vpop.eup %927  ;;  %v518_v62 = vadd.f32 1.0, %v926_v59  ;;  %947 = vpow2.f32 %v805_v57 }
  0xf8   : > { %v930_v63 = vpop.eup %929  ;;  %949 = vrcp.f32 %v510_v60  ;;  %v508_v0 = vadd.f32 1.0, %v928_v61 }
  0xf9   : > { %v932_v1 = vpop.eup %931  ;;  %951 = vrcp.f32 %v518_v62  ;;  %v516_v2 = vadd.f32 1.0, %v930_v63 }
  0xfa   : > { %v934_v3 = vpop.eup %933  ;;  %953 = vrcp.f32 %v508_v0  ;;  %v511_v4 = vadd.f32 1.0, %v932_v1 }
  0xfb   : > { %v936_v5 = vpop.eup %935  ;;  %955 = vrcp.f32 %v516_v2  ;;  %v519_v6 = vadd.f32 1.0, %v934_v3 }
  0xfc   : > { %v938_v7 = vpop.eup %937  ;;  %957 = vrcp.f32 %v511_v4  ;;  %v509_v8 = vadd.f32 1.0, %v936_v5 }
  0xfd   : > { %v940_v9 = vpop.eup %939  ;;  %959 = vrcp.f32 %v519_v6  ;;  %v517_v10 = vadd.f32 1.0, %v938_v7 }
  0xfe   : > { %v942_v12 = vpop.eup %941  ;;  %961 = vrcp.f32 %v509_v8  ;;  %v514_v13 = vadd.f32 1.0, %v940_v9 }
  0xff   : > { %v944_v16 = vpop.eup %943  ;;  %963 = vrcp.f32 %v517_v10  ;;  %v522_v18 = vadd.f32 1.0, %v942_v12 }
 0x100   : > { %v946_v22 = vpop.eup %945  ;;  %965 = vrcp.f32 %v514_v13  ;;  %v512_v23 = vadd.f32 1.0, %v944_v16 }
 0x101   : > { %v948_v24 = vpop.eup %947  ;;  %967 = vrcp.f32 %v522_v18  ;;  %v520_v27 = vadd.f32 1.0, %v946_v22 }
 0x102   : > { %v950_v29 = vpop.eup %949  ;;  %969 = vrcp.f32 %v512_v23  ;;  %v515_v30 = vadd.f32 1.0, %v948_v24 }
 0x103   : > { %v952_v34 = vpop.eup %951  ;;  %v558_v35 = vmul.f32 %v950_v29, %v1081_v17  ;;  %971 = vrcp.f32 %v520_v27 }
 0x104   : > { %v954_v37 = vpop.eup %953  ;;  %v566_v38 = vmul.f32 %v952_v34, %v1084_v20  ;;  %973 = vrcp.f32 %v515_v30 }
 0x105   : > { %v956_v39 = vpop.eup %955  ;;  %v834_v40 = vpack.c.bf16 %v558_v35, %v558_v35  ;;  %v556_v17 = vmul.f32 %v954_v37, %v1087_v21  ;;  %975 = vpow2.f32 %v813_v28 }
 0x106   : > { %v958_v42 = vpop.eup %957  ;;  %v842_v43 = vpack.c.bf16 %v566_v38, %v566_v38  ;;  %v564_v46 = vmul.f32 %v956_v39, %v1091_v25  ;;  %977 = vpow2.f32 %v803_v33 }
 0x107   : > { %v960_v47 = vpop.eup %959  ;;  %639 = vst.msk [vmem:[%s1150_s4 + $0x8] sm:$0xf] %vm636_vm3, %v834_v40  ;;  %v832_v48 = vpack.c.bf16 %v556_v17, %v556_v17  ;;  %v559_v20 = vmul.f32 %v958_v42, %v1094_v26  ;;  %979 = vpow2.f32 %v811_v15 }
 0x108   : > { %v962_v51 = vpop.eup %961  ;;  %647 = vst.msk [vmem:[%s1150_s4 + $0x28] sm:$0xf] %vm636_vm3, %v842_v43  ;;  %v840_v21 = vpack.c.bf16 %v564_v46, %v564_v46  ;;  %v567_v52 = vmul.f32 %v960_v47, %v1099_v31 }
 0x109   : > { %v964_v53 = vpop.eup %963  ;;  %637 = vst.msk [vmem:[%s1150_s4] sm:$0xf] %vm636_vm3, %v832_v48  ;;  %v835_v25 = vpack.c.bf16 %v559_v20, %v559_v20  ;;  %v557_v54 = vmul.f32 %v962_v51, %v1102_v32 }
 0x10a   : > { %v966_v55 = vpop.eup %965  ;;  %645 = vst.msk [vmem:[%s1150_s4 + $0x20] sm:$0xf] %vm636_vm3, %v840_v21  ;;  %v843_v26 = vpack.c.bf16 %v567_v52, %v567_v52  ;;  %v565_v56 = vmul.f32 %v964_v53, %v1107_v36 }
 0x10b   : > { %v968_v57 = vpop.eup %967  ;;  %640 = vst.msk [vmem:[%s1150_s4 + $0xc] sm:$0xf] %vm636_vm3, %v835_v25  ;;  %v833_v58 = vpack.c.bf16 %v557_v54, %v557_v54  ;;  %v562_v31 = vmul.f32 %v966_v55, %v1113_v41 }
 0x10c   : > { %v970_v59 = vpop.eup %969  ;;  %648 = vst.msk [vmem:[%s1150_s4 + $0x2c] sm:$0xf] %vm636_vm3, %v843_v26  ;;  %v841_v60 = vpack.c.bf16 %v565_v56, %v565_v56  ;;  %v570_v32 = vmul.f32 %v968_v57, %v1116_v44 }
 0x10d   : > { %v972_v61 = vpop.eup %971  ;;  %638 = vst.msk [vmem:[%s1150_s4 + $0x4] sm:$0xf] %vm636_vm3, %v833_v58  ;;  %v838_v62 = vpack.c.bf16 %v562_v31, %v562_v31  ;;  %v560_v36 = vmul.f32 %v970_v59, %v1119_v45 }
 0x10e   : > { %v974_v63 = vpop.eup %973  ;;  %646 = vst.msk [vmem:[%s1150_s4 + $0x24] sm:$0xf] %vm636_vm3, %v841_v60  ;;  %v846_v0 = vpack.c.bf16 %v570_v32, %v570_v32  ;;  %v568_v41 = vmul.f32 %v972_v61, %v1123_v49 }
 0x10f   : > { %v976_v1 = vpop.eup %975  ;;  %643 = vst.msk [vmem:[%s1150_s4 + $0x18] sm:$0xf] %vm636_vm3, %v838_v62  ;;  %v836_v2 = vpack.c.bf16 %v560_v36, %v560_v36  ;;  %v563_v44 = vmul.f32 %v974_v63, %v1126_v50 }
 0x110   : > { %v978_v3 = vpop.eup %977  ;;  %651 = vst.msk [vmem:[%s1150_s4 + $0x38] sm:$0xf] %vm636_vm3, %v846_v0  ;;  %v844_v4 = vpack.c.bf16 %v568_v41, %v568_v41  ;;  %v523_v5 = vadd.f32 1.0, %v976_v1 }
 0x111   : > { %v980_v45 = vpop.eup %979  ;;  %641 = vst.msk [vmem:[%s1150_s4 + $0x10] sm:$0xf] %vm636_vm3, %v836_v2  ;;  %v839_v6 = vpack.c.bf16 %v563_v44, %v563_v44  ;;  %v513_v7 = vadd.f32 1.0, %v978_v3 }
 0x112   : > { %649 = vst.msk [vmem:[%s1150_s4 + $0x30] sm:$0xf] %vm636_vm3, %v844_v4  ;;  %981 = vrcp.f32 %v523_v5  ;;  %v521_v49 = vadd.f32 1.0, %v980_v45 }
 0x113   : > { %644 = vst.msk [vmem:[%s1150_s4 + $0x1c] sm:$0xf] %vm636_vm3, %v839_v6  ;;  %983 = vrcp.f32 %v513_v7 }
 0x114   : > { %985 = vrcp.f32 %v521_v49 }
 0x11c   : > { %v982_v50 = vpop.eup %981 }
 0x11d   : > { %v984_v8 = vpop.eup %983  ;;  %v571_v9 = vmul.f32 %v982_v50, %v1133_v11 }
 0x11e   : > { %v986_v10 = vpop.eup %985  ;;  %v561_v12 = vmul.f32 %v984_v8, %v1136_v14 }
 0x11f   : > { %v847_v13 = vpack.c.bf16 %v571_v9, %v571_v9  ;;  %v569_v16 = vmul.f32 %v986_v10, %v1139_v19 }
 0x120   : > { %v837_v18 = vpack.c.bf16 %v561_v12, %v561_v12 }
 0x121   : > { %652 = vst.msk [vmem:[%s1150_s4 + $0x3c] sm:$0xf] %vm636_vm3, %v847_v13  ;;  %v845_v22 = vpack.c.bf16 %v569_v16, %v569_v16 }
 0x122   : > { %642 = vst.msk [vmem:[%s1150_s4 + $0x14] sm:$0xf] %vm636_vm3, %v837_v18 }
 0x123   : > { %650 = vst.msk [vmem:[%s1150_s4 + $0x34] sm:$0xf] %vm636_vm3, %v845_v22 }
 0x124 PF: > { %s13_s14 = sadd.s32 1, %s1009_s14   ;;  %s1212_s12 = smov %s1005_s13 }
 0x125   : > { %p10_p5 = scmp.ge.s32.totalorder %s13_s14, 4   ;;  %s1213_s13 = smov %s1215_s15 }
 0x127   :  { %12 = sbr.rel (!%p10_p5) target bundleno = 2 (0x2), region = 68 }

</bundles_post_ra>
